<compile_context>
chip_gen: v7x
topology: tpu7x:2x2x1
jax: 0.10.0
libtpu: 0.0.40
codegen_flags: <defaults>
</compile_context>

<pallas_src>
import math
import jax
import jax.numpy as jnp
from jax.experimental import pallas as pl
from jax.experimental.pallas import tpu as pltpu


def _mlp_kernel(x_ref, w1_ref, b1_ref, w2_ref, b2_ref, o_ref):
    """One row-tile: (TM, F0) @ (F0, F1) + b1 -> exact GELU -> @ (F1, F2) + b2."""
    # Layer 1 on the MXU, f32 accumulation.
    h = jnp.dot(x_ref[...], w1_ref[...], preferred_element_type=jnp.float32)
    h = h + b1_ref[...]                                  # (TM, F1) + (1, F1) broadcast
    # Exact (erf-based) GELU — matches torch.nn.functional.gelu default.
    h = 0.5 * h * (1.0 + jax.lax.erf(h * jnp.float32(1.0 / math.sqrt(2.0))))
    # Layer 2 on the MXU, f32 accumulation; store full (lane-dense) F2 block.
    y = jnp.dot(h, w2_ref[...], preferred_element_type=jnp.float32)
    o_ref[...] = (y + b2_ref[...]).astype(o_ref.dtype)


def _pick_tm(m, f0, f1, f2, requested):
    """Largest row-tile (multiple of 8) that keeps VMEM use under a safe budget."""
    budget = 20 * 1024 * 1024                 # leave headroom under 32 MiB scoped limit
    resident = 4 * (f0 * f1 + f1 + f1 * f2 + f2)          # weights + biases (f32)
    # Per-row bytes: double-buffered x & out tiles + hidden/activation working set.
    per_row = 4 * (2 * f0 + 2 * f2 + 2 * f1)
    avail = max(budget - resident, 8 * per_row)
    tm = avail // per_row
    tm = min(tm, requested, ((m + 7) // 8) * 8)
    tm = max(8, (tm // 8) * 8)
    return int(tm)


def kaiming_mlp_forward(x, w1, b1, w2, b2, *, tm=512):
    """Fused forward pass of kaiming_mlp.

    x : (..., n_filters0)
    w1: (n_filters0, n_filters1)   # torch's mlp1.weight.T
    b1: (n_filters1,)
    w2: (n_filters1, n_filters2)   # torch's mlp2.weight.T
    b2: (n_filters2,)
    returns (..., n_filters2)
    """
    orig_shape = x.shape
    f0 = orig_shape[-1]
    f1 = w1.shape[1]
    f2 = w2.shape[1]

    x2 = x.reshape(-1, f0).astype(jnp.float32)
    m = x2.shape[0]

    tm = _pick_tm(m, f0, f1, f2, tm)
    m_pad = pl.cdiv(m, tm) * tm
    if m_pad != m:
        x2 = jnp.pad(x2, ((0, m_pad - m), (0, 0)))

    out = pl.pallas_call(
        _mlp_kernel,
        out_shape=jax.ShapeDtypeStruct((m_pad, f2), jnp.float32),
        grid_spec=pltpu.PrefetchScalarGridSpec(
            num_scalar_prefetch=0,
            grid=(m_pad // tm,),
            in_specs=[
                pl.BlockSpec((tm, f0), lambda i: (i, 0)),   # activation row-tile
                pl.BlockSpec((f0, f1), lambda i: (0, 0)),   # W1 (resident in VMEM)
                pl.BlockSpec((1, f1), lambda i: (0, 0)),    # b1 (resident)
                pl.BlockSpec((f1, f2), lambda i: (0, 0)),   # W2 (resident)
                pl.BlockSpec((1, f2), lambda i: (0, 0)),    # b2 (resident)
            ],
            out_specs=pl.BlockSpec((tm, f2), lambda i: (i, 0)),
        ),
        compiler_params=pltpu.CompilerParams(
            dimension_semantics=("parallel",),
            vmem_limit_bytes=32 * 1024 * 1024,
        ),
    )(x2,
      w1.astype(jnp.float32),
      b1.reshape(1, f1).astype(jnp.float32),
      w2.astype(jnp.float32),
      b2.reshape(1, f2).astype(jnp.float32))

    out = out[:m]
    return out.reshape(*orig_shape[:-1], f2)


def reference_forward(x, w1, b1, w2, b2):
    """Pure-JAX reference mirroring the PyTorch module (Linear -> exact GELU -> Linear)."""
    h = x @ w1 + b1
    h = jax.nn.gelu(h, approximate=False)
    return h @ w2 + b2


if __name__ == "__main__":
    # Small shapes consistent with the module.
    n_filters0, n_filters1, n_filters2 = 32, 64, 32
    batch, seq = 2, 8

    key = jax.random.PRNGKey(0)
    kx, kw1, kb1, kw2, kb2 = jax.random.split(key, 5)

    # kaiming_normal_ analogue (fan_in mode, gain=sqrt(2)) on (in, out)-layout weights.
    w1 = jax.random.normal(kw1, (n_filters0, n_filters1), jnp.float32) * math.sqrt(2.0 / n_filters0)
    w2 = jax.random.normal(kw2, (n_filters1, n_filters2), jnp.float32) * math.sqrt(2.0 / n_filters1)
    # torch Linear default bias init: U(-1/sqrt(fan_in), 1/sqrt(fan_in)).
    b1 = jax.random.uniform(kb1, (n_filters1,), jnp.float32,
                            -1.0 / math.sqrt(n_filters0), 1.0 / math.sqrt(n_filters0))
    b2 = jax.random.uniform(kb2, (n_filters2,), jnp.float32,
                            -1.0 / math.sqrt(n_filters1), 1.0 / math.sqrt(n_filters1))

    x = jax.random.normal(kx, (batch, seq, n_filters0), jnp.float32)

    out = jax.block_until_ready(kaiming_mlp_forward(x, w1, b1, w2, b2))
    ref = jax.block_until_ready(reference_forward(x, w1, b1, w2, b2))

    assert out.shape == (batch, seq, n_filters2), out.shape
    assert jnp.allclose(out, ref, rtol=1e-4, atol=1e-4), \
        float(jnp.max(jnp.abs(out - ref)))

    print("KERNEL_OK")
</pallas_src>

<mosaic_0001>
module attributes {stable_mosaic.version = 11 : i64} {
  func.func @_mlp_kernel(%arg0: i32, %arg1: memref<16x32xf32, #tpu.memory_space<vmem>>, %arg2: memref<32x64xf32, #tpu.memory_space<vmem>>, %arg3: memref<1x64xf32, #tpu.memory_space<vmem>>, %arg4: memref<64x32xf32, #tpu.memory_space<vmem>>, %arg5: memref<1x32xf32, #tpu.memory_space<vmem>>, %arg6: memref<16x32xf32, #tpu.memory_space<vmem>>) attributes {dimension_semantics = [#tpu.dimension_semantics<parallel>], iteration_bounds = array<i64: 1>, scalar_prefetch = 0 : i64, scratch_operands = 0 : i64, tpu.core_type = #tpu.core_type<tc>, window_params = [{transform_indices = @transform_0, window_bounds = array<i64: 16, 32>}, {pipeline_mode = #tpu.pipeline_mode<synchronous>, transform_indices = @transform_1, window_bounds = array<i64: 32, 64>}, {pipeline_mode = #tpu.pipeline_mode<synchronous>, transform_indices = @transform_2, window_bounds = array<i64: 1, 64>}, {pipeline_mode = #tpu.pipeline_mode<synchronous>, transform_indices = @transform_3, window_bounds = array<i64: 64, 32>}, {pipeline_mode = #tpu.pipeline_mode<synchronous>, transform_indices = @transform_4, window_bounds = array<i64: 1, 32>}, {transform_indices = @transform_5, window_bounds = array<i64: 16, 32>}]} {
    %c0 = arith.constant 0 : index
    %c0_0 = arith.constant 0 : index
    %0 = vector.load %arg1[%c0, %c0_0] : memref<16x32xf32, #tpu.memory_space<vmem>>, vector<16x32xf32>
    %c0_1 = arith.constant 0 : index
    %c0_2 = arith.constant 0 : index
    %1 = vector.load %arg2[%c0_1, %c0_2] : memref<32x64xf32, #tpu.memory_space<vmem>>, vector<32x64xf32>
    %cst = arith.constant dense<0.000000e+00> : vector<16x64xf32>
    %2 = tpu.matmul %0, %1, %cst {dimension_numbers = #tpu.dot_dimension_numbers<[1], [0], [0], [1], [0, 0, 1, 1], [], []>} : vector<16x32xf32>, vector<32x64xf32>, vector<16x64xf32> -> vector<16x64xf32>
    %c0_3 = arith.constant 0 : index
    %c0_4 = arith.constant 0 : index
    %3 = vector.load %arg3[%c0_3, %c0_4] : memref<1x64xf32, #tpu.memory_space<vmem>>, vector<1x64xf32>
    %4 = vector.broadcast %3 : vector<1x64xf32> to vector<16x64xf32>
    %5 = arith.addf %2, %4 : vector<16x64xf32>
    %cst_5 = arith.constant 5.000000e-01 : f32
    %6 = vector.broadcast %cst_5 : f32 to vector<16x64xf32>
    %7 = arith.mulf %6, %5 : vector<16x64xf32>
    %cst_6 = arith.constant 0.707106769 : f32
    %8 = vector.broadcast %cst_6 : f32 to vector<16x64xf32>
    %9 = arith.mulf %5, %8 : vector<16x64xf32>
    %10 = math.erf %9 : vector<16x64xf32>
    %cst_7 = arith.constant 1.000000e+00 : f32
    %11 = vector.broadcast %cst_7 : f32 to vector<16x64xf32>
    %12 = arith.addf %11, %10 : vector<16x64xf32>
    %13 = arith.mulf %7, %12 : vector<16x64xf32>
    %c0_8 = arith.constant 0 : index
    %c0_9 = arith.constant 0 : index
    %14 = vector.load %arg4[%c0_8, %c0_9] : memref<64x32xf32, #tpu.memory_space<vmem>>, vector<64x32xf32>
    %cst_10 = arith.constant dense<0.000000e+00> : vector<16x32xf32>
    %15 = tpu.matmul %13, %14, %cst_10 {dimension_numbers = #tpu.dot_dimension_numbers<[1], [0], [0], [1], [0, 0, 1, 1], [], []>} : vector<16x64xf32>, vector<64x32xf32>, vector<16x32xf32> -> vector<16x32xf32>
    %c0_11 = arith.constant 0 : index
    %c0_12 = arith.constant 0 : index
    %16 = vector.load %arg5[%c0_11, %c0_12] : memref<1x32xf32, #tpu.memory_space<vmem>>, vector<1x32xf32>
    %17 = vector.broadcast %16 : vector<1x32xf32> to vector<16x32xf32>
    %18 = arith.addf %15, %17 : vector<16x32xf32>
    %c0_13 = arith.constant 0 : index
    %c0_14 = arith.constant 0 : index
    %19 = vector.load %arg6[%c0_13, %c0_14] : memref<16x32xf32, #tpu.memory_space<vmem>>, vector<16x32xf32>
    tpu.vector_store %arg6[%c0_13, %c0_14], %18 {strides = array<i32>} : memref<16x32xf32, #tpu.memory_space<vmem>>, vector<16x32xf32>,
    return
  }
  func.func @transform_0(%arg0: i32) -> (i32, i32) {
    %c0_i32 = arith.constant 0 : i32
    %c0_i32_0 = arith.constant 0 : i32
    return %arg0, %c0_i32 : i32, i32
  }
  func.func @transform_1(%arg0: i32) -> (i32, i32) {
    %c0_i32 = arith.constant 0 : i32
    %c0_i32_0 = arith.constant 0 : i32
    %c0_i32_1 = arith.constant 0 : i32
    return %c0_i32, %c0_i32_0 : i32, i32
  }
  func.func @transform_2(%arg0: i32) -> (i32, i32) {
    %c0_i32 = arith.constant 0 : i32
    %c0_i32_0 = arith.constant 0 : i32
    %c0_i32_1 = arith.constant 0 : i32
    return %c0_i32, %c0_i32_0 : i32, i32
  }
  func.func @transform_3(%arg0: i32) -> (i32, i32) {
    %c0_i32 = arith.constant 0 : i32
    %c0_i32_0 = arith.constant 0 : i32
    %c0_i32_1 = arith.constant 0 : i32
    return %c0_i32, %c0_i32_0 : i32, i32
  }
  func.func @transform_4(%arg0: i32) -> (i32, i32) {
    %c0_i32 = arith.constant 0 : i32
    %c0_i32_0 = arith.constant 0 : i32
    %c0_i32_1 = arith.constant 0 : i32
    return %c0_i32, %c0_i32_0 : i32, i32
  }
  func.func @transform_5(%arg0: i32) -> (i32, i32) {
    %c0_i32 = arith.constant 0 : i32
    %c0_i32_0 = arith.constant 0 : i32
    return %arg0, %c0_i32 : i32, i32
  }
}

</mosaic_0001>

<bundles_post_ra>
// kernel: tpu_custom_call.1
= control target key start
LH: loop header
LB: loop body
LE: loop exit
PB: predicated region body
PF: predicated region fallthrough
CT: control target
= control target key end

     0   :  { %vm34_vm0 = vcmask 261120   ;;  %s445_s0 = inlined_call_operand.vmem [shape: f32[16,32], index: 0, kind: input, shape index: {}]   ;;  %s446_s1 = inlined_call_operand.vmem [shape: f32[32,64], index: 1, kind: input, shape index: {}]   ;;  %s447_s2 = inlined_call_operand.vmem [shape: f32[1,64], index: 2, kind: input, shape index: {}]   ;;  %s448_s3 = inlined_call_operand.vmem [shape: f32[64,32], index: 3, kind: input, shape index: {}]   ;;  %s449_s4 = inlined_call_operand.vmem [shape: f32[1,32], index: 4, kind: input, shape index: {}]   ;;  %s450_s5 = inlined_call_operand.hbm [shape: f32[16,32], index: 5, kind: output, shape index: {}]  }
   0x1   :  { %v23_v0 = vld [vmem:[%s446_s1] sm:$0xff]  ;;  %v24_v1 = vld [vmem:[%s446_s1 + $0x8] sm:$0xff]  ;;  %v25_v2 = vld [vmem:[%s446_s1 + $0x10] sm:$0xff] }
   0x2   :  { %v293_v3 = vpack.c.bf16 %v24_v1, %v23_v0  ;;  %v26_v4 = vld [vmem:[%s446_s1 + $0x18] sm:$0xff]  ;;  %v21_v5 = vld [vmem:[%s445_s0] sm:$0xff] }
   0x3   :  { %v297_v6 = vpack.c.bf16 %v26_v4, %v25_v2  ;;  %271 = vmatprep.mubr.msk.f32.mxu0 %vm34_vm0, %v21_v5 }
   0x4   :  { %10 = vsyncpa [#allocation3], 0  ;;  %294 = vmatprep.subr.bf16.mxu0 %v293_v3  ;;  %v22_v7 = vld [vmem:[%s445_s0 + $0x8] sm:$0xff]  ;;  %v126_v8 = vld [vmem:[%s448_s3] sm:$0xff]  ;;  %vm141_vm1 = vcmask 523264   ;;  %s348_s21 = smov [#allocation2]  }
   0x5   :  { %296 = vmatpush3.bf16.msra.mxu0 %v293_v3  ;;  %v127_v9 = vld [vmem:[%s448_s3 + $0x8] sm:$0xff]  ;;  %v128_v11 = vld [vmem:[%s448_s3 + $0x10] sm:$0xff]  ;;  %v129_v12 = vld [vmem:[%s448_s3 + $0x18] sm:$0xff]  ;;  %s230_s22 = sshll.u32 %s348_s21, 4  ;;  %s231_s22 = int_to_ptr.vmem [resolvable:$true] %s230_s22 }
   0x6   :  { %298 = vmatprep.subr.bf16.mxu0 %v297_v6  ;;  %v301_v10 = vpack.c.bf16 %v127_v9, %v126_v8  ;;  %v305_v13 = vpack.c.bf16 %v129_v12, %v128_v11  ;;  %v130_v14 = vld [vmem:[%s448_s3 + $0x20] sm:$0xff]  ;;  %v131_v15 = vld [vmem:[%s448_s3 + $0x28] sm:$0xff]  ;;  %v132_v17 = vld [vmem:[%s448_s3 + $0x30] sm:$0xff]  ;;  %s324_s23 = scalar_lea.vmem %s231_s22, 256  ;;  %p329_p1 = scmp.lt.s32.totalorder %s231_s22, %s231_s22 }
   0x7   :  { %v309_v16 = vpack.c.bf16 %v131_v15, %v130_v14  ;;  %v133_v18 = vld [vmem:[%s448_s3 + $0x38] sm:$0xff]  ;;  %v241_v20 = vld [vmem:[%s447_s2] ss:$0 sm:$0xff]  ;;  %p325_p0 = scmp.ne.s32.totalorder %s231_s22, %s324_s23  ;;  %p330_p2 = scmp.lt.s32.totalorder %s324_s23, %s324_s23 }
   0x8   :  { %302 = vmatprep.subr.bf16.mxu1 %v301_v10  ;;  %v313_v19 = vpack.c.bf16 %v133_v18, %v132_v17  ;;  %v244_v35 = vld [vmem:[%s449_s4] ss:$0 sm:$0xff] }
   0x9   :  { %300 = vmatpush3.bf16.msra.mxu0 %v297_v6  ;;  %304 = vmatpush3.bf16.msra.mxu1 %v301_v10  ;;  %p331_p3 = por %p330_p2, %p329_p1 }
   0xa   :  { %306 = vmatprep.subr.bf16.mxu1 %v305_v13 }
   0xb   :  { %p332_p4 = pnand %p331_p3, %p325_p0 }
   0xc   :  { %272 = vmatmul.mubr.msk.f32.vlgmr.msra.gmra.mrb[0].mxu0 %vm34_vm0, %v22_v7 }
   0xd   :  { %308 = vmatpush3.bf16.msra.mxu1 %v305_v13 }
   0xe   :  { %310 = vmatprep.subr.bf16.mxu1 %v309_v16 }
  0x11   :  { %312 = vmatpush3.bf16.msra.mxu1 %v309_v16 }
  0x12   :  { %314 = vmatprep.subr.bf16.mxu1 %v313_v19 }
  0x15   :  { %316 = vmatpush3.bf16.msra.mxu1 %v313_v19 }
  0xdf   :  { %v273_v21 = vpop.f32.mrb[0].mxu0 }
  0xe0   :  { %v113_v22 = vadd.f32 %v273_v21, %v241_v20  ;;  %v107_v23 = vpop.f32.mrb[1].mxu0 }
  0xe1   :  { %v108_v24 = vadd.f32 %v241_v20, %v107_v23 }
  0xe2   :  { %v119_v25 = vmul.f32 0.70710677, %v113_v22  ;;  %v117_v32 = vmul.f32 0.5, %v113_v22 }
  0xe3   :  { %v118_v26 = vmul.f32 0.70710677, %v108_v24  ;;  %v116_v30 = vmul.f32 0.5, %v108_v24 }
  0xe4   :  { %320 = verf.f32 %v119_v25 }
  0xe5   :  { %322 = verf.f32 %v118_v26 }
  0xee   :  { %v321_v27 = vpop.eup %320 }
  0xef   :  { %v323_v28 = vpop.eup %322  ;;  %v123_v29 = vadd.f32 1.0, %v321_v27 }
  0xf0   :  { %v122_v31 = vadd.f32 1.0, %v323_v28 }
  0xf1   :  { %v125_v34 = vmul.f32 %v123_v29, %v117_v32 }
  0xf2   :  { %v124_v33 = vmul.f32 %v122_v31, %v116_v30 }
  0xf4   :  { %290 = vmatprep.mubr.msk.f32.mxu1 %vm141_vm1, %v124_v33 }
  0xf5   :  { %291 = vmatmul.mubr.msk.f32.vlgmr.msra.gmra.mrb[0].mxu1 %vm141_vm1, %v125_v34 }
 0x1c8   :  { %v292_v36 = vpop.f32.mrb[0].mxu1 }
 0x1c9   :  { %v220_v37 = vadd.f32 %v292_v36, %v244_v35  ;;  %v214_v38 = vpop.f32.mrb[1].mxu1 }
 0x1ca   :  { %v215_v39 = vadd.f32 %v244_v35, %v214_v38 }
 0x1cb   :  { %224 = vst.msk [vmem:[#allocation2 + $0x8] sm:$0xff] %vm34_vm0, %v220_v37 }
 0x1cc   :  { %223 = vst.msk [vmem:[#allocation2] sm:$0xff] %vm34_vm0, %v215_v39 }
 0x1cd   :  { %335 = shalt.err (!%p332_p4)
}
 0x1ce   :  { %s336_s25 = scalar_lea.hbm %s450_s5, 256 }
 0x1cf   :  { %p337_p5 = scmp.ne.s32.totalorder %s450_s5, %s336_s25  ;;  %p340_p6 = scmp.lt.u32.totalorder %s336_s25, %s450_s5 }
 0x1d1   :  { %p342_p7 = pnand %p340_p6, %p337_p5 }
 0x1d3   :  { %345 = shalt.err (!%p342_p7)
}
 0x1d4   :  { %s349_s30 = smov 128   ;;  %s350_s1 = smov 8  }
 0x1d5   :  { %236 = dma.vmem_to_hbm [thread:$0]  %s231_s22, 256, %s450_s5, [#allocation3], %s349_s30, %s349_s30, %s350_s1  }
 0x1d6   :  { %346 = dma.done.wait [#allocation3], 256  }
 0x1d7   :  { %347 = vsyncadd [#allocation3], 4294967040 }
 0x1d8   :  { %240 = vsyncpa [#allocation3], 1 }

</bundles_post_ra>
